<compile_context>
chip_gen: v7x
topology: tpu7x:2x2x1
jax: 0.10.0
libtpu: 0.0.40
codegen_flags: <defaults>
</compile_context>

<pallas_src>
import jax
import jax.numpy as jnp
from jax.experimental import pallas as pl
from jax.experimental.pallas import tpu as pltpu

NEG_SLOPE = 0.01   # nn.LeakyReLU default
BN_EPS = 1e-5      # nn.BatchNorm2d default


def _round8(v):
    return ((v + 7) // 8) * 8


def _round128(v):
    return ((v + 127) // 128) * 128


def _vmem_budgets():
    """Generation-aware VMEM sizing.  v5e/v6e: 128 MiB physical per TensorCore -> big blocks.
    v7x: 64 MiB -> tighter cap, and keep >=2 'parallel' grid steps so both TCs get work."""
    try:
        phys = int(pltpu.get_tpu_info().vmem_capacity_bytes)
    except Exception:
        phys = 64 * 1024 * 1024                       # conservative fallback (v7x-sized)
    vmem_limit = min(int(phys * 0.85), 100 * 1024 * 1024)
    block_budget = vmem_limit // 2
    prefer_multi_step = phys <= 64 * 1024 * 1024      # v7x heuristic: shard g axis over 2 TCs
    return vmem_limit, block_budget, prefer_multi_step


def _slab_bytes(GB, NP, widths, na):
    """Conservative per-grid-step VMEM footprint with (8,128) tile padding.
    Pipelined in/out blocks are counted double-buffered; large in-kernel temporaries single."""
    C0, C = widths[0], widths[-1]
    mb = max(1, GB // na)
    rows = GB * NP
    # double-buffered pipelined blocks
    x_blk = GB * _round8(NP) * _round128(C0) * 2                      # bf16 input rows
    m_blk = mb * 8 * _round128(NP) * 4                                 # (mb,1,NP) mask (pass 2)
    pooled_blk = GB * _round128(C) * 4                                 # (1,GB,C) output block
    small_blk = 4 * 8 * _round128(C) * 4                               # s1/ssd or scale/shift/bd1
    w_blk = sum(_round8(ci) * _round128(co) * 2
                for ci, co in zip(widths[:-1], widths[1:]))
    w_blk += _round8(C) * _round128(2 * C) * 2                         # merged Wd1
    pipelined = 2 * (x_blk + m_blk + pooled_blk + small_blk + w_blk)
    # single-buffered large temporaries (flattened (GB*NP, *) activations)
    tmp = rows * (_round128(C0) * 2                                    # x reshape (bf16)
                  + max(_round128(w) for w in widths[1:]) * (4 + 2)    # widest MLP act f32 + bf16
                  + _round128(2 * C) * 4                               # merged hcat
                  + 2 * _round128(C) * 4)                              # h1 and BN/centred copy
    return pipelined + tmp


def _choose_gb(G, na, NP, widths, budget, prefer_multi):
    """Largest GB (divisor of G, with GB | na or na | GB so the de-replicated mask maps cleanly)
    whose padded working set fits the budget.  On v7x prefer >= 2 grid steps for 2-TC sharding."""
    def mask_ok(gb):
        return (na % gb == 0) or (gb % na == 0)
    cands = [d for d in range(1, G + 1)
             if G % d == 0 and mask_ok(d) and _slab_bytes(d, NP, widths, na) <= budget]
    if not cands:
        cands = [1]
    if prefer_multi:
        multi = [d for d in cands if G // d >= 2]
        if multi:
            return max(multi)
    return max(cands)


# --------------------------- shared trunk: MLP + pool + merged dense-conv1 --------------------
def _trunk(x_blk, w_list, wcat, bd1, GB, NP, C):
    """x_blk: (GB, NP, C0) bf16 (mask already folded).  Returns h1 (GB,NP,C) f32, pooled (GB,C) f32."""
    C0 = x_blk.shape[-1]
    h = x_blk.reshape(GB * NP, C0)                   # stack slabs: one matmul per layer per block
    for W, b in w_list:                              # 1x1 conv == row-stacked matmul, shared weights
        h = jnp.maximum(
            jnp.dot(h.astype(W.dtype), W, preferred_element_type=jnp.float32) + b, 0.0)
    pooled = jnp.mean(h.reshape(GB, NP, C), axis=1)                                  # (GB, C)
    # merged dense-conv1: single (GB*NP, C) x (C, 2C) matmul, columns = [shared | pooled-weight]
    hcat = jnp.dot(h.astype(wcat.dtype), wcat, preferred_element_type=jnp.float32)   # (GB*NP, 2C)
    hs = hcat[:, :C].reshape(GB, NP, C)
    hp = jnp.mean(hcat[:, C:].reshape(GB, NP, C), axis=1)        # == pooled @ Wd1p (linearity)
    h1 = hs + hp[:, None, :] + bd1                               # (GB, NP, C), bd1 is (1, C)
    return h1, pooled


# ----------------------- Pass 1 kernel: pooled + mean-centred BN partials ---------------------
def _make_stats_kernel(n_layers, GB, NP, C):
    def kernel(*refs):
        x_ref = refs[0]
        w_refs = refs[1:1 + 2 * n_layers]
        wcat_ref = refs[1 + 2 * n_layers]
        bd1_ref = refs[2 + 2 * n_layers]
        pooled_ref, s1_ref, ssd_ref = refs[3 + 2 * n_layers:6 + 2 * n_layers]

        w_list = [(w_refs[2 * l][...], w_refs[2 * l + 1][...]) for l in range(n_layers)]
        h1, pooled = _trunk(x_ref[...], w_list, wcat_ref[...], bd1_ref[...], GB, NP, C)

        pooled_ref[...] = pooled[None]                           # (1, GB, C): sublane/lane dense
        # Mean-centred BatchNorm partials; combined Chan-style in the wrapper (avoids the
        # catastrophic cancellation of a raw E[x^2] - E[x]^2 reduction).
        h1f = h1.reshape(GB * NP, C)
        s1 = jnp.sum(h1f, axis=0, keepdims=True)                 # (1, C)
        mblk = s1 * (1.0 / (GB * NP))
        ssd = jnp.sum((h1f - mblk) ** 2, axis=0, keepdims=True)  # (1, C)
        s1_ref[...] = s1[None]
        ssd_ref[...] = ssd[None]
    return kernel


# ------------- Pass 2 kernel: recompute h1, BN-apply + LeakyReLU + masked point sum -----------
def _make_apply_kernel(n_layers, GB, NP, C, mb):
    def kernel(*refs):
        x_ref, m_ref = refs[0], refs[1]
        w_refs = refs[2:2 + 2 * n_layers]
        wcat_ref = refs[2 + 2 * n_layers]
        bd1_ref = refs[3 + 2 * n_layers]
        scale_ref = refs[4 + 2 * n_layers]
        shift_ref = refs[5 + 2 * n_layers]
        v_ref = refs[6 + 2 * n_layers]

        w_list = [(w_refs[2 * l][...], w_refs[2 * l + 1][...]) for l in range(n_layers)]
        h1, _ = _trunk(x_ref[...], w_list, wcat_ref[...], bd1_ref[...], GB, NP, C)

        hn = h1 * scale_ref[...] + shift_ref[...]                # BatchNorm, precomputed batch stats
        hn = jnp.where(hn >= 0.0, hn, NEG_SLOPE * hn)            # LeakyReLU
        # Fold the mask into the point reduction BEFORE the Wd2/anchor projections (linearity):
        # only a (GB, C) vector leaves the kernel.  m_ref holds one mask row per covered batch.
        m = m_ref[...]                                           # (mb, 1, NP)
        hn4 = hn.reshape(mb, GB // mb, NP, C)
        v = jnp.sum(hn4 * m[:, :, :, None], axis=2).reshape(GB, C)
        v_ref[...] = v[None]                                     # (1, GB, C)
    return kernel


# --------------------------------------- pallas_call wrappers ---------------------------------
def _weight_specs_and_args(Wts, bs, Wcat, bd1):
    specs, args = [], []
    for Wt, b in zip(Wts, bs):
        specs.append(pl.BlockSpec(tuple(Wt.shape), lambda g: (0, 0)))
        specs.append(pl.BlockSpec(tuple(b.shape), lambda g: (0, 0)))
        args += [Wt, b]
    specs.append(pl.BlockSpec(tuple(Wcat.shape), lambda g: (0, 0)))
    specs.append(pl.BlockSpec(tuple(bd1.shape), lambda g: (0, 0)))
    args += [Wcat, bd1]
    return specs, args


def stats_pass(x_rows, Wts, bs, Wcat, bd1, GB, vmem_limit):
    G, NP, C0 = x_rows.shape
    C = Wcat.shape[0]
    n_layers = len(Wts)
    nblk = G // GB
    wspecs, wargs = _weight_specs_and_args(Wts, bs, Wcat, bd1)
    in_specs = [pl.BlockSpec((GB, NP, C0), lambda g: (g, 0, 0))] + wspecs
    out_shape = (jax.ShapeDtypeStruct((nblk, GB, C), jnp.float32),
                 jax.ShapeDtypeStruct((nblk, 1, C), jnp.float32),
                 jax.ShapeDtypeStruct((nblk, 1, C), jnp.float32))
    out_specs = (pl.BlockSpec((1, GB, C), lambda g: (g, 0, 0)),
                 pl.BlockSpec((1, 1, C), lambda g: (g, 0, 0)),
                 pl.BlockSpec((1, 1, C), lambda g: (g, 0, 0)))
    return pl.pallas_call(
        _make_stats_kernel(n_layers, GB, NP, C),
        out_shape=out_shape,
        grid=(nblk,),
        in_specs=in_specs,
        out_specs=out_specs,
        compiler_params=pltpu.CompilerParams(
            dimension_semantics=("parallel",),
            vmem_limit_bytes=vmem_limit),
    )(x_rows, *wargs)


def apply_pass(x_rows, mask3, Wts, bs, Wcat, bd1, scale, shift, GB, mb, na, vmem_limit):
    G, NP, C0 = x_rows.shape
    C = Wcat.shape[0]
    n_layers = len(Wts)
    nblk = G // GB
    wspecs, wargs = _weight_specs_and_args(Wts, bs, Wcat, bd1)
    # De-replicated mask: (nb, 1, NP) in HBM; each grid step pulls the batch rows it covers.
    mask_map = lambda g: ((g * GB // na) // mb, 0, 0)
    in_specs = ([pl.BlockSpec((GB, NP, C0), lambda g: (g, 0, 0)),
                 pl.BlockSpec((mb, 1, NP), mask_map)]
                + wspecs
                + [pl.BlockSpec(tuple(scale.shape), lambda g: (0, 0)),
                   pl.BlockSpec(tuple(shift.shape), lambda g: (0, 0))])
    return pl.pallas_call(
        _make_apply_kernel(n_layers, GB, NP, C, mb),
        out_shape=jax.ShapeDtypeStruct((nblk, GB, C), jnp.float32),
        grid=(nblk,),
        in_specs=in_specs,
        out_specs=pl.BlockSpec((1, GB, C), lambda g: (g, 0, 0)),
        compiler_params=pltpu.CompilerParams(
            dimension_semantics=("parallel",),
            vmem_limit_bytes=vmem_limit),
    )(x_rows, mask3, *wargs, scale, shift)


# ------------------------------------- Full forward wrapper -----------------------------------
def so3_out_block_rt_with_mask(feats, mask, xyz, anchors, P):
    """feats: (nb, C_in, np, na) NCHW; mask: (nb, np); xyz: (nb, 3, np); anchors: (nb, na, 3, 3)."""
    nb, c0, NP, na = feats.shape
    G = nb * na
    C = P['mlp_W'][-1].shape[0]

    # Fold the mask into x up front (fuses with the NCHW->rows transpose copy XLA performs) and
    # store the rows in bf16: x is the only large HBM operand and is read once per pass.
    xm = feats * mask[:, None, :, None]
    x_rows = jnp.transpose(xm, (0, 3, 2, 1)).reshape(G, NP, c0).astype(jnp.bfloat16)
    mask3 = mask[:, None, :].astype(jnp.float32)                 # (nb, 1, NP), de-replicated

    # bf16 MXU operands (f32 accumulation via preferred_element_type)
    Wts = [jnp.transpose(W).astype(jnp.bfloat16) for W in P['mlp_W']]
    bs = [b[None, :].astype(jnp.float32) for b in P['mlp_b']]
    Wd1p = jnp.transpose(P['Wd1'][:, :C])                        # pooled half of cat([pooled, shared])
    Wd1s = jnp.transpose(P['Wd1'][:, C:])                        # shared half
    Wcat = jnp.concatenate([Wd1s, Wd1p], axis=1).astype(jnp.bfloat16)   # merged (C, 2C)
    bd1 = P['bd1'][None, :].astype(jnp.float32)

    widths = [c0] + [int(W.shape[0]) for W in P['mlp_W']]
    vmem_limit, budget, prefer_multi = _vmem_budgets()
    GB = _choose_gb(G, na, NP, widths, budget, prefer_multi)
    mb = max(1, GB // na)                                        # mask rows (batches) per block
    nblk = G // GB

    # Pass 1: MLP + mean-pool + merged dense-conv1 -> pooled + mean-centred BN partials.
    pooled, s1, ssd = stats_pass(x_rows, Wts, bs, Wcat, bd1, GB, vmem_limit)

    # Chan-style combination of per-block partials: BatchNorm2d training-mode (biased) stats.
    n_b = float(GB * NP)
    mean_b = s1[:, 0, :] / n_b                                   # (nblk, C)
    mu = jnp.mean(mean_b, axis=0)                                # equal block counts
    var = (jnp.sum(ssd[:, 0, :], axis=0)
           + n_b * jnp.sum((mean_b - mu) ** 2, axis=0)) / (G * NP)
    var = jnp.maximum(var, 0.0)
    scale = P['gamma'] / jnp.sqrt(var + BN_EPS)
    shift = P['beta'] - mu * scale

    # Pass 2: recompute h1 from x (no f32 (G,NP,C) HBM round-trip), BN + LeakyReLU, masked sum.
    v = apply_pass(x_rows, mask3, Wts, bs, Wcat, bd1,
                   scale[None, :].astype(jnp.float32), shift[None, :].astype(jnp.float32),
                   GB, mb, na, vmem_limit)
    v = v.reshape(nb, na, C)
    pooled_ba = pooled.reshape(nb, na, C)

    msum = jnp.sum(mask, axis=1)                                 # (nb,)
    # sum_p m_p*(Wd2 hn_p + bd2) == (sum_p m_p hn_p) Wd2^T + bd2 * sum_p m_p
    tsum = (jnp.einsum('bac,tc->bat', v, P['Wd2'])
            + P['bd2'][None, None, :] * msum[:, None, None])     # (nb, na, 3)
    r = jnp.einsum('bac,rc->bar', pooled_ba, P['Wr']) + P['br'][None, None, :]   # (nb, na, 4)

    # y_t = (anchors @ t + xyz), mask-averaged over points (linearity -> reorder sums)
    denom = jnp.maximum(msum, 1e-8)
    xyz_w = jnp.sum(xyz * mask[:, None, :], axis=-1)             # (nb, 3)
    T = (jnp.einsum('baij,baj->bai', anchors, tsum) + xyz_w[:, None, :]) / denom[:, None, None]
    return {'R': jnp.transpose(r, (0, 2, 1)), 'T': jnp.transpose(T, (0, 2, 1))}


# ------------------------------------ Plain-JAX reference -------------------------------------
def reference_forward(feats, mask, xyz, anchors, P):
    nb, c0, NP, na = feats.shape
    with jax.default_matmul_precision("highest"):
        x = feats * mask[:, None, :, None]
        for W, b in zip(P['mlp_W'], P['mlp_b']):
            x = jnp.einsum('oc,bcpa->bopa', W, x) + b[None, :, None, None]
            x = jnp.maximum(x, 0.0)
        shared = x
        pooled = shared.mean(axis=2)
        cat = jnp.concatenate(
            [jnp.broadcast_to(pooled[:, :, None, :], shared.shape), shared], axis=1)
        h1 = jnp.einsum('oc,bcpa->bopa', P['Wd1'], cat) + P['bd1'][None, :, None, None]
        mu = h1.mean(axis=(0, 2, 3))
        var = h1.var(axis=(0, 2, 3))
        h1n = (h1 - mu[None, :, None, None]) / jnp.sqrt(var[None, :, None, None] + BN_EPS)
        h1n = h1n * P['gamma'][None, :, None, None] + P['beta'][None, :, None, None]
        h1n = jnp.where(h1n >= 0, h1n, NEG_SLOPE * h1n)
        t = jnp.einsum('oc,bcpa->bopa', P['Wd2'], h1n) + P['bd2'][None, :, None, None]
        t = t.reshape(nb, 1, 3, NP, na)
        t_perm = jnp.transpose(t, (0, 1, 4, 2, 3))                   # (nb,1,na,3,np)
        y_t = jnp.einsum('baij,bhajp->bhaip', anchors, t_perm) + xyz[:, None, None, :, :]
        m5 = mask[:, None, None, None, :]
        y_t = jnp.sum(y_t * m5, axis=-1) / jnp.maximum(jnp.sum(m5, axis=-1), 1e-8)
        y_t = jnp.transpose(y_t, (0, 1, 3, 2))                       # (nb,1,3,na)
        R = jnp.einsum('oc,bca->boa', P['Wr'], pooled) + P['br'][None, :, None]
        return R, y_t[:, 0]


# -------------------------------------- Param construction ------------------------------------
def init_params(key, c_in, mlp, num_heads=1):
    keys = iter(jax.random.split(key, 32))
    P = {'mlp_W': [], 'mlp_b': []}
    prev = c_in
    for c in mlp:                                  # nn.Conv2d(c_in, c, 1)
        P['mlp_W'].append(0.2 * jax.random.normal(next(keys), (c, prev), jnp.float32))
        P['mlp_b'].append(0.1 * jax.random.normal(next(keys), (c,), jnp.float32))
        prev = c
    C = mlp[-1]
    P['Wd1'] = 0.2 * jax.random.normal(next(keys), (C, 2 * C), jnp.float32)   # Conv2d(2C, C, 1)
    P['bd1'] = 0.1 * jax.random.normal(next(keys), (C,), jnp.float32)
    P['gamma'] = 1.0 + 0.1 * jax.random.normal(next(keys), (C,), jnp.float32)  # BatchNorm2d(C)
    P['beta'] = 0.1 * jax.random.normal(next(keys), (C,), jnp.float32)
    P['Wd2'] = 0.2 * jax.random.normal(next(keys), (3 * num_heads, C), jnp.float32)  # Conv2d(C, 3, 1)
    P['bd2'] = 0.1 * jax.random.normal(next(keys), (3 * num_heads,), jnp.float32)
    P['Wr'] = 0.2 * jax.random.normal(next(keys), (4 * num_heads, C), jnp.float32)   # Conv1d(C, 4, 1)
    P['br'] = 0.1 * jax.random.normal(next(keys), (4 * num_heads,), jnp.float32)
    return P


if __name__ == "__main__":
    nb, c_in, NP, na = 2, 16, 32, 4
    mlp = [32, 32]

    key = jax.random.PRNGKey(0)
    k1, k2, k3, k4, kp = jax.random.split(key, 5)
    feats = jax.random.normal(k1, (nb, c_in, NP, na), jnp.float32)       # x.feats (NCHW)
    mask = (jax.random.uniform(k2, (nb, NP)) > 0.3).astype(jnp.float32)  # per-point mask
    xyz = jax.random.normal(k3, (nb, 3, NP), jnp.float32)                # x.xyz
    anchors = jax.random.normal(k4, (nb, na, 3, 3), jnp.float32)         # per-batch anchor rotations
    P = init_params(kp, c_in, mlp)

    out = so3_out_block_rt_with_mask(feats, mask, xyz, anchors, P)
    jax.block_until_ready(out)

    R_ref, T_ref = reference_forward(feats, mask, xyz, anchors, P)
    assert out['R'].shape == (nb, 4, na) and out['T'].shape == (nb, 3, na)
    # bf16 MXU operands / bf16 x rows vs a float32-"highest" reference -> slightly wider tolerance.
    assert jnp.allclose(out['R'], R_ref, atol=2e-2, rtol=2e-2)
    assert jnp.allclose(out['T'], T_ref, atol=2e-2, rtol=2e-2)
    print("KERNEL_OK")
</pallas_src>

<mosaic_0001>
module attributes {stable_mosaic.version = 11 : i64} {
  func.func @kernel(%arg0: i32, %arg1: memref<4x32x16xbf16, #tpu.memory_space<vmem>>, %arg2: memref<16x32xbf16, #tpu.memory_space<vmem>>, %arg3: memref<1x32xf32, #tpu.memory_space<vmem>>, %arg4: memref<32x32xbf16, #tpu.memory_space<vmem>>, %arg5: memref<1x32xf32, #tpu.memory_space<vmem>>, %arg6: memref<32x64xbf16, #tpu.memory_space<vmem>>, %arg7: memref<1x32xf32, #tpu.memory_space<vmem>>, %arg8: memref<1x4x32xf32, #tpu.memory_space<vmem>>, %arg9: memref<1x1x32xf32, #tpu.memory_space<vmem>>, %arg10: memref<1x1x32xf32, #tpu.memory_space<vmem>>) attributes {dimension_semantics = [#tpu.dimension_semantics<parallel>], iteration_bounds = array<i64: 2>, scalar_prefetch = 0 : i64, scratch_operands = 0 : i64, tpu.core_type = #tpu.core_type<tc>, window_params = [{transform_indices = @transform_0, window_bounds = array<i64: 4, 32, 16>}, {pipeline_mode = #tpu.pipeline_mode<synchronous>, transform_indices = @transform_1, window_bounds = array<i64: 16, 32>}, {pipeline_mode = #tpu.pipeline_mode<synchronous>, transform_indices = @transform_2, window_bounds = array<i64: 1, 32>}, {pipeline_mode = #tpu.pipeline_mode<synchronous>, transform_indices = @transform_3, window_bounds = array<i64: 32, 32>}, {pipeline_mode = #tpu.pipeline_mode<synchronous>, transform_indices = @transform_4, window_bounds = array<i64: 1, 32>}, {pipeline_mode = #tpu.pipeline_mode<synchronous>, transform_indices = @transform_5, window_bounds = array<i64: 32, 64>}, {pipeline_mode = #tpu.pipeline_mode<synchronous>, transform_indices = @transform_6, window_bounds = array<i64: 1, 32>}, {transform_indices = @transform_7, window_bounds = array<i64: 1, 4, 32>}, {transform_indices = @transform_8, window_bounds = array<i64: 1, 1, 32>}, {transform_indices = @transform_9, window_bounds = array<i64: 1, 1, 32>}]} {
    %c0 = arith.constant 0 : index
    %c0_0 = arith.constant 0 : index
    %0 = vector.load %arg2[%c0, %c0_0] : memref<16x32xbf16, #tpu.memory_space<vmem>>, vector<16x32xbf16>
    %c0_1 = arith.constant 0 : index
    %c0_2 = arith.constant 0 : index
    %1 = vector.load %arg3[%c0_1, %c0_2] : memref<1x32xf32, #tpu.memory_space<vmem>>, vector<1x32xf32>
    %c0_3 = arith.constant 0 : index
    %c0_4 = arith.constant 0 : index
    %2 = vector.load %arg4[%c0_3, %c0_4] : memref<32x32xbf16, #tpu.memory_space<vmem>>, vector<32x32xbf16>
    %c0_5 = arith.constant 0 : index
    %c0_6 = arith.constant 0 : index
    %3 = vector.load %arg5[%c0_5, %c0_6] : memref<1x32xf32, #tpu.memory_space<vmem>>, vector<1x32xf32>
    %c0_7 = arith.constant 0 : index
    %c0_8 = arith.constant 0 : index
    %c0_9 = arith.constant 0 : index
    %4 = vector.load %arg1[%c0_7, %c0_8, %c0_9] : memref<4x32x16xbf16, #tpu.memory_space<vmem>>, vector<4x32x16xbf16>
    %c0_10 = arith.constant 0 : index
    %c0_11 = arith.constant 0 : index
    %5 = vector.load %arg6[%c0_10, %c0_11] : memref<32x64xbf16, #tpu.memory_space<vmem>>, vector<32x64xbf16>
    %c0_12 = arith.constant 0 : index
    %c0_13 = arith.constant 0 : index
    %6 = vector.load %arg7[%c0_12, %c0_13] : memref<1x32xf32, #tpu.memory_space<vmem>>, vector<1x32xf32>
    %7 = vector.shape_cast %4 : vector<4x32x16xbf16> to vector<128x16xbf16>
    %cst = arith.constant dense<0.000000e+00> : vector<128x32xf32>
    %8 = tpu.matmul %7, %0, %cst {dimension_numbers = #tpu.dot_dimension_numbers<[1], [0], [0], [1], [0, 0, 1, 1], [], []>} : vector<128x16xbf16>, vector<16x32xbf16>, vector<128x32xf32> -> vector<128x32xf32>
    %9 = vector.broadcast %1 : vector<1x32xf32> to vector<128x32xf32>
    %10 = arith.addf %8, %9 : vector<128x32xf32>
    %cst_14 = arith.constant 0.000000e+00 : f32
    %11 = vector.broadcast %cst_14 : f32 to vector<128x32xf32>
    %12 = arith.maximumf %10, %11 : vector<128x32xf32>
    %13 = arith.truncf %12 : vector<128x32xf32> to vector<128x32xbf16>
    %cst_15 = arith.constant dense<0.000000e+00> : vector<128x32xf32>
    %14 = tpu.matmul %13, %2, %cst_15 {dimension_numbers = #tpu.dot_dimension_numbers<[1], [0], [0], [1], [0, 0, 1, 1], [], []>} : vector<128x32xbf16>, vector<32x32xbf16>, vector<128x32xf32> -> vector<128x32xf32>
    %15 = vector.broadcast %3 : vector<1x32xf32> to vector<128x32xf32>
    %16 = arith.addf %14, %15 : vector<128x32xf32>
    %cst_16 = arith.constant 0.000000e+00 : f32
    %17 = vector.broadcast %cst_16 : f32 to vector<128x32xf32>
    %18 = arith.maximumf %16, %17 : vector<128x32xf32>
    %19 = vector.shape_cast %18 : vector<128x32xf32> to vector<4x32x32xf32>
    %cst_17 = arith.constant dense<0.000000e+00> : vector<4x32xf32>
    %20 = vector.multi_reduction <add>, %19, %cst_17 [1] : vector<4x32x32xf32> to vector<4x32xf32>
    %cst_18 = arith.constant 3.200000e+01 : f32
    %21 = vector.broadcast %cst_18 : f32 to vector<4x32xf32>
    %22 = arith.divf %20, %21 : vector<4x32xf32>
    %23 = arith.truncf %18 : vector<128x32xf32> to vector<128x32xbf16>
    %cst_19 = arith.constant dense<0.000000e+00> : vector<128x64xf32>
    %24 = tpu.matmul %23, %5, %cst_19 {dimension_numbers = #tpu.dot_dimension_numbers<[1], [0], [0], [1], [0, 0, 1, 1], [], []>} : vector<128x32xbf16>, vector<32x64xbf16>, vector<128x64xf32> -> vector<128x64xf32>
    %25 = vector.extract_strided_slice %24 {offsets = [0, 0], sizes = [128, 32], strides = [1, 1]} : vector<128x64xf32> to vector<128x32xf32>
    %26 = vector.shape_cast %25 : vector<128x32xf32> to vector<4x32x32xf32>
    %27 = vector.extract_strided_slice %24 {offsets = [0, 32], sizes = [128, 32], strides = [1, 1]} : vector<128x64xf32> to vector<128x32xf32>
    %28 = vector.shape_cast %27 : vector<128x32xf32> to vector<4x32x32xf32>
    %cst_20 = arith.constant dense<0.000000e+00> : vector<4x32xf32>
    %29 = vector.multi_reduction <add>, %28, %cst_20 [1] : vector<4x32x32xf32> to vector<4x32xf32>
    %cst_21 = arith.constant 3.200000e+01 : f32
    %30 = vector.broadcast %cst_21 : f32 to vector<4x32xf32>
    %31 = arith.divf %29, %30 : vector<4x32xf32>
    %32 = vector.shape_cast %31 : vector<4x32xf32> to vector<4x1x32xf32>
    %33 = vector.broadcast %32 : vector<4x1x32xf32> to vector<4x32x32xf32>
    %34 = arith.addf %26, %33 : vector<4x32x32xf32>
    %35 = vector.shape_cast %6 : vector<1x32xf32> to vector<1x1x32xf32>
    %36 = vector.broadcast %35 : vector<1x1x32xf32> to vector<4x32x32xf32>
    %37 = arith.addf %34, %36 : vector<4x32x32xf32>
    %38 = vector.shape_cast %22 : vector<4x32xf32> to vector<1x4x32xf32>
    %c0_22 = arith.constant 0 : index
    %c0_23 = arith.constant 0 : index
    %c0_24 = arith.constant 0 : index
    %39 = vector.load %arg8[%c0_22, %c0_23, %c0_24] : memref<1x4x32xf32, #tpu.memory_space<vmem>>, vector<1x4x32xf32>
    tpu.vector_store %arg8[%c0_22, %c0_23, %c0_24], %38 {strides = array<i32>} : memref<1x4x32xf32, #tpu.memory_space<vmem>>, vector<1x4x32xf32>,
    %40 = vector.shape_cast %37 : vector<4x32x32xf32> to vector<128x32xf32>
    %cst_25 = arith.constant dense<0.000000e+00> : vector<32xf32>
    %41 = vector.multi_reduction <add>, %40, %cst_25 [0] : vector<128x32xf32> to vector<32xf32>
    %42 = vector.shape_cast %41 : vector<32xf32> to vector<1x32xf32>
    %cst_26 = arith.constant 7.812500e-03 : f32
    %43 = vector.broadcast %cst_26 : f32 to vector<1x32xf32>
    %44 = arith.mulf %42, %43 : vector<1x32xf32>
    %45 = vector.broadcast %44 : vector<1x32xf32> to vector<128x32xf32>
    %46 = arith.subf %40, %45 : vector<128x32xf32>
    %47 = arith.mulf %46, %46 : vector<128x32xf32>
    %cst_27 = arith.constant dense<0.000000e+00> : vector<32xf32>
    %48 = vector.multi_reduction <add>, %47, %cst_27 [0] : vector<128x32xf32> to vector<32xf32>
    %49 = vector.shape_cast %48 : vector<32xf32> to vector<1x32xf32>
    %50 = vector.shape_cast %42 : vector<1x32xf32> to vector<1x1x32xf32>
    %c0_28 = arith.constant 0 : index
    %c0_29 = arith.constant 0 : index
    %c0_30 = arith.constant 0 : index
    %51 = vector.load %arg9[%c0_28, %c0_29, %c0_30] : memref<1x1x32xf32, #tpu.memory_space<vmem>>, vector<1x1x32xf32>
    tpu.vector_store %arg9[%c0_28, %c0_29, %c0_30], %50 {strides = array<i32>} : memref<1x1x32xf32, #tpu.memory_space<vmem>>, vector<1x1x32xf32>,
    %52 = vector.shape_cast %49 : vector<1x32xf32> to vector<1x1x32xf32>
    %c0_31 = arith.constant 0 : index
    %c0_32 = arith.constant 0 : index
    %c0_33 = arith.constant 0 : index
    %53 = vector.load %arg10[%c0_31, %c0_32, %c0_33] : memref<1x1x32xf32, #tpu.memory_space<vmem>>, vector<1x1x32xf32>
    tpu.vector_store %arg10[%c0_31, %c0_32, %c0_33], %52 {strides = array<i32>} : memref<1x1x32xf32, #tpu.memory_space<vmem>>, vector<1x1x32xf32>,
    return
  }
  func.func @transform_0(%arg0: i32) -> (i32, i32, i32) {
    %c0_i32 = arith.constant 0 : i32
    %c0_i32_0 = arith.constant 0 : i32
    %c0_i32_1 = arith.constant 0 : i32
    return %arg0, %c0_i32, %c0_i32_0 : i32, i32, i32
  }
  func.func @transform_1(%arg0: i32) -> (i32, i32) {
    %c0_i32 = arith.constant 0 : i32
    %c0_i32_0 = arith.constant 0 : i32
    %c0_i32_1 = arith.constant 0 : i32
    return %c0_i32, %c0_i32_0 : i32, i32
  }
  func.func @transform_2(%arg0: i32) -> (i32, i32) {
    %c0_i32 = arith.constant 0 : i32
    %c0_i32_0 = arith.constant 0 : i32
    %c0_i32_1 = arith.constant 0 : i32
    return %c0_i32, %c0_i32_0 : i32, i32
  }
  func.func @transform_3(%arg0: i32) -> (i32, i32) {
    %c0_i32 = arith.constant 0 : i32
    %c0_i32_0 = arith.constant 0 : i32
    %c0_i32_1 = arith.constant 0 : i32
    return %c0_i32, %c0_i32_0 : i32, i32
  }
  func.func @transform_4(%arg0: i32) -> (i32, i32) {
    %c0_i32 = arith.constant 0 : i32
    %c0_i32_0 = arith.constant 0 : i32
    %c0_i32_1 = arith.constant 0 : i32
    return %c0_i32, %c0_i32_0 : i32, i32
  }
  func.func @transform_5(%arg0: i32) -> (i32, i32) {
    %c0_i32 = arith.constant 0 : i32
    %c0_i32_0 = arith.constant 0 : i32
    %c0_i32_1 = arith.constant 0 : i32
    return %c0_i32, %c0_i32_0 : i32, i32
  }
  func.func @transform_6(%arg0: i32) -> (i32, i32) {
    %c0_i32 = arith.constant 0 : i32
    %c0_i32_0 = arith.constant 0 : i32
    %c0_i32_1 = arith.constant 0 : i32
    return %c0_i32, %c0_i32_0 : i32, i32
  }
  func.func @transform_7(%arg0: i32) -> (i32, i32, i32) {
    %c0_i32 = arith.constant 0 : i32
    %c0_i32_0 = arith.constant 0 : i32
    %c0_i32_1 = arith.constant 0 : i32
    return %arg0, %c0_i32, %c0_i32_0 : i32, i32, i32
  }
  func.func @transform_8(%arg0: i32) -> (i32, i32, i32) {
    %c0_i32 = arith.constant 0 : i32
    %c0_i32_0 = arith.constant 0 : i32
    %c0_i32_1 = arith.constant 0 : i32
    return %arg0, %c0_i32, %c0_i32_0 : i32, i32, i32
  }
  func.func @transform_9(%arg0: i32) -> (i32, i32, i32) {
    %c0_i32 = arith.constant 0 : i32
    %c0_i32_0 = arith.constant 0 : i32
    %c0_i32_1 = arith.constant 0 : i32
    return %arg0, %c0_i32, %c0_i32_0 : i32, i32, i32
  }
}

</mosaic_0001>

<bundles_post_ra>
// kernel: tpu_custom_call.1
= control target key start
LH: loop header
LB: loop body
LE: loop exit
PB: predicated region body
PF: predicated region fallthrough
CT: control target
= control target key end

     0   :  { %s2144_s0 = inlined_call_operand.vmem [shape: bf16[8,32,16], index: 0, kind: input, shape index: {}]   ;;  %s2145_s1 = inlined_call_operand.vmem [shape: bf16[16,32], index: 1, kind: input, shape index: {}]   ;;  %s2146_s2 = inlined_call_operand.vmem [shape: f32[1,32], index: 2, kind: input, shape index: {}]   ;;  %s2147_s3 = inlined_call_operand.vmem [shape: bf16[32,32], index: 3, kind: input, shape index: {}]   ;;  %s2148_s4 = inlined_call_operand.vmem [shape: f32[1,32], index: 4, kind: input, shape index: {}]   ;;  %s2149_s5 = inlined_call_operand.vmem [shape: bf16[32,64], index: 5, kind: input, shape index: {}]   ;;  %s2150_s6 = inlined_call_operand.vmem [shape: f32[1,32], index: 6, kind: input, shape index: {}]   ;;  %s2151_s7 = inlined_call_operand.hbm [shape: f32[2,4,32], index: 7, kind: output, shape index: {0}]   ;;  %s2152_s8 = inlined_call_operand.hbm [shape: f32[2,1,32], index: 8, kind: output, shape index: {1}]   ;;  %s2153_s9 = inlined_call_operand.hbm [shape: f32[2,1,32], index: 9, kind: output, shape index: {2}]  }
   0x1   :  { %2155 = sst [smem:[#allocation9_spill]] %s2144_s0 }
   0x2   :  { %15 = vsyncpa [#allocation3], 0 }
   0x3   :  { %17 = vsyncpa [#allocation3 + $0x1], 0 }
   0x4   :  { %18 = vsyncpa [#allocation5], 0 }
   0x5   :  { %20 = vsyncpa [#allocation5 + $0x1], 0  ;;  %s1713_s30 = smov 0   ;;  %s1715_s10 = smov 0  }
   0x6   :  { %s1717_s11 = smov 0   ;;  %s1719_s12 = smov 0  }
   0x7 LB: > { %s1734_s13 = sadd.s32 4294967295, %s1657_s12   ;;  %s2154_s14 = sadd.s32 4294967294, %s1657_s12   ;;  %s1657_s12 = sphi %s1719_s12, %s2163_s12   ;;  %s1653_s11 = sphi %s1717_s11, %s2162_s11   ;;  %s1649_s10 = sphi %s1715_s10, %s2161_s10   ;;  %s1645_s30 = sphi %s1713_s30, %s2160_s30  }
   0x8   : > { %s1738_s15 = sadd.s32 1, %s1657_s12   ;;  %s185_s16 = sadd.s32 1, %s1653_s11 }
   0x9   : > { %s182_s17 = ssub.s32 %s1657_s12, %s1738_s15  ;;  %p195_p0 = scmp.ne.s32.totalorder %s1653_s11, %s1649_s10 }
   0xa   : > { %p183_p1 = scmp.eq.s32.totalorder %s182_s17, 0  ;;  %p196_p2 = scmp.eq.s32.totalorder %s1734_s13, 1 }
   0xb   : > { %p201_p3 = scmp.ne.s32.totalorder %s1649_s10, %s1645_s30  ;;  %p202_p4 = scmp.eq.s32.totalorder %s2154_s14, 1 }
   0xc   : > { %s1751_s18 = scalar_select %p183_p1, %s1653_s11, %s185_s16  }
   0xd   : > { %p1753_p5 = por %p196_p2, %p195_p0  ;;  %p1757_p6 = por %p202_p4, %p201_p3 }
   0xe   : > { %p1331_p7 = scmp.ge.s32.totalorder %s1657_s12, 1  ;;  %p300_p8 = scmp.lt.s32.totalorder %s1657_s12, 3 }
  0x10   : > { %p301_p9 = pnand %p1331_p7, %p300_p8 }
  0x11   : > { %v1522_v0 = vld [vmem:[%s2145_s1] sm:$0xff] (!%p301_p9)   ;;  %s1333_s23 = sshll.u32 (!%p301_p9), %s1734_s13, 2  ;;  %s2158_s0 = sld [smem:[#allocation9_spill]] (!%p301_p9)  ;;  %vm434_vm0 = vcmask (!%p301_p9), 130048   ;;  %v1532_v10 = vld [vmem:[%s2147_s3 + $0x8] sm:$0xff] (!%p301_p9)   ;;  %vm598_vm1 = vcmask (!%p301_p9), 261120  }
  0x12   : > { %304 = sbr.rel (%p301_p9) target bundleno = 950 (0x3b6), region = 48  ;;  %p346_p10 = scmp.lt.s32.totalorder (!%p301_p9), %s1333_s23, 7  ;;  %1412 = vmatprep.subr.bf16.mxu0 (!%p301_p9), %v1522_v0  ;;  %1470 = vmatprep.subr.bf16.mxu1 (!%p301_p9), %v1522_v0  ;;  %v1531_v1 = vld [vmem:[%s2147_s3] sm:$0xff] (!%p301_p9)   ;;  %vm1049_vm2 = vcmask (!%p301_p9), 1041409   ;;  %vm1051_vm3 = vcmask (!%p301_p9), 1042434   ;;  %vm1053_vm4 = vcmask (!%p301_p9), 1043459  }
  0x13   : > { %1413 = vmatpush3.bf16.msra.mxu0 (!%p301_p9), %v1522_v0  ;;  %1471 = vmatpush3.bf16.msra.mxu1 (!%p301_p9), %v1522_v0  ;;  %v1533_v11 = vld [vmem:[%s2149_s5] sm:$0xff] (!%p301_p9)   ;;  %vm1056_vm5 = vcmask (!%p301_p9), 257024   ;;  %vm934_vm6 = vcmask (!%p301_p9), 523520   ;;  %s1659_s21 = smov (!%p301_p9), 96   ;;  %s1377_s22 = sshll.u32 (!%p301_p9), %s1734_s13, 6 }
  0x14   : > { %1430 = vmatprep.subr.bf16.mxu1 (!%p301_p9), %v1531_v1  ;;  %1450 = vmatprep.subr.bf16.mxu0 (!%p301_p9), %v1533_v11  ;;  %v1336_v12 = vld [vmem:[%s2146_s2] ss:$0 sm:$0xff] (!%p301_p9) }
  0x19   : > { %s2165_s23 = smov (!%p346_p10, %s1333_s23), 7 }
  0x1a   : > { %s1382_s26 = sshll.u32 %s2165_s23, 4 }
  0x1b   : > { %s350_s29 = scalar_lea.vmem %s2158_s0, %s1382_s26  ;;  %s1926_s26 = scalar_lea.hbm %s2151_s7, %s1377_s22 }
  0x1c   : > { %v1523_v2 = vld [vmem:[%s350_s29] sm:$0xff]   ;;  %v1524_v3 = vld [vmem:[%s350_s29 + $0x8] sm:$0xff]   ;;  %v1525_v4 = vld [vmem:[%s350_s29 + $0x10] sm:$0xff]  }
  0x1d   : > { %1414 = vmatprep.mubr.msk.bf16.mxu0 %vm434_vm0, %v1523_v2  ;;  %v1527_v5 = vld [vmem:[%s350_s29 + $0x20] sm:$0xff]   ;;  %v1528_v6 = vld [vmem:[%s350_s29 + $0x28] sm:$0xff]   ;;  %v1529_v7 = vld [vmem:[%s350_s29 + $0x30] sm:$0xff]  }
  0x1e   : > { %1415 = vmatmul.mubr.msk.bf16.vlgmr.msra.gmra.mrb[0].mxu0 %vm434_vm0, %v1524_v3  ;;  %1422 = vmatprep.mubr.msk.bf16.mxu1 %vm434_vm0, %v1527_v5  ;;  %v1526_v8 = vld [vmem:[%s350_s29 + $0x18] sm:$0xff]   ;;  %v1534_v5 = vld [vmem:[%s2149_s5 + $0x8] sm:$0xff]  }
  0x1f   : > { %1418 = vmatprep.mubr.msk.bf16.mxu0 %vm434_vm0, %v1525_v4  ;;  %1423 = vmatmul.mubr.msk.bf16.vlgmr.msra.gmra.mrb[0].mxu1 %vm434_vm0, %v1528_v6  ;;  %v1530_v9 = vld [vmem:[%s350_s29 + $0x38] sm:$0xff]   ;;  %v1804_v6 = vld [vmem:[%s2148_s4] ss:$0 sm:$0xff]  ;;  %s1847_s29 = sand.u32 1, %s1649_s10  }
  0x20   : > { %1426 = vmatprep.mubr.msk.bf16.mxu1 %vm434_vm0, %v1529_v7  ;;  %1431 = vmatpush3.bf16.msra.mxu1 %v1531_v1  ;;  %s1332_s16 = sshll.u32 %s1847_s29, 2  ;;  %s1169_s27 = scalar_lea.sflag [#allocation3], %s1847_s29 }
  0x21   : > { %1432 = vmatprep.subr.bf16.mxu1 %v1532_v10  ;;  %1451 = vmatpush3.bf16.msra.mxu0 %v1533_v11  ;;  %s1850_s17 = scalar_lea.vmem [#allocation2], %s1332_s16  ;;  %s1660_s16 = smov [#allocation2]  }
  0x22   : > { %1452 = vmatprep.subr.bf16.mxu0 %v1534_v5  ;;  %s1190_s23 = sshll.u32 %s1850_s17, 4  ;;  %s1539_s14 = sshll.u32 %s1660_s16, 4  ;;  %s1191_s23 = int_to_ptr.vmem [resolvable:$true] %s1190_s23  ;;  %s1540_s14 = int_to_ptr.vmem [resolvable:$false] %s1539_s14 }
  0x23   : > { %s1535_s28 = scalar_lea.vmem %s1191_s23, 64  ;;  %s1541_s0 = scalar_lea.vmem %s1540_s14, 128 }
  0x24   : > { %1433 = vmatpush3.bf16.msra.mxu1 %v1532_v10  ;;  %p1536_p11 = scmp.ne.s32.totalorder %s1191_s23, %s1535_s28  ;;  %p1542_p0 = scmp.lt.s32.totalorder %s1191_s23, %s1540_s14 }
  0x25   : > { %1453 = vmatpush3.bf16.msra.mxu0 %v1534_v5  ;;  %p1543_p1 = scmp.lt.s32.totalorder %s1541_s0, %s1535_s28 }
  0x26   : > { %1419 = vmatmul.mubr.msk.bf16.gmra.mrb[4].mxu0 %vm434_vm0, %v1526_v8  ;;  %p1537_p12 = pnand %p1536_p11, %p1753_p5 }
  0x27   : > { %1427 = vmatmul.mubr.msk.bf16.gmra.mrb[4].mxu1 %vm434_vm0, %v1530_v9  ;;  %p1544_p2 = por %p1543_p1, %p1542_p0 }
  0x28   : > { %p1538_p13 = pneg %p1537_p12 }
  0x2a   : > { %p1545_p3 = pnand %p1544_p2, %p1538_p13 }
  0xf1   : > { %v1416_v13 = vpop.f32.mrb[0].mxu0 }
  0xf2   : > { %v502_v14 = vadd.f32 %v1416_v13, %v1336_v12  ;;  %v493_v15 = vpop.f32.mrb[1].mxu0  ;;  %v1424_v21 = vpop.f32.mrb[0].mxu1 }
  0xf3   : > { %v494_v16 = vadd.f32 %v1336_v12, %v493_v15  ;;  %v1417_v17 = vpop.f32.mrb[2].mxu0  ;;  %v534_v24 = vadd.f32 %v1424_v21, %v1336_v12  ;;  %v525_v25 = vpop.f32.mrb[1].mxu1 }
  0xf4   : > { %v505_v18 = vadd.f32 %v1417_v17, %v1336_v12  ;;  %v496_v19 = vpop.f32.mrb[3].mxu0  ;;  %v558_v22 = vmax.f32 %v502_v14, 0.0  ;;  %v526_v28 = vadd.f32 %v1336_v12, %v525_v25  ;;  %v1425_v29 = vpop.f32.mrb[2].mxu1 }
  0xf5   : > { %v497_v20 = vadd.f32 %v1336_v12, %v496_v19  ;;  %v556_v26 = vmax.f32 %v494_v16, 0.0  ;;  %v566_v31 = vmax.f32 %v534_v24, 0.0  ;;  %v537_v32 = vadd.f32 %v1425_v29, %v1336_v12  ;;  %v528_v33 = vpop.f32.mrb[3].mxu1 }
  0xf6   : > { %v559_v23 = vmax.f32 %v505_v18, 0.0  ;;  %v564_v36 = vmax.f32 %v526_v28, 0.0  ;;  %v529_v37 = vadd.f32 %v1336_v12, %v528_v33 }
  0xf7   : > { %v557_v27 = vmax.f32 %v497_v20, 0.0  ;;  %v567_v40 = vmax.f32 %v537_v32, 0.0 }
  0xf8   : > { %v573_v30 = vpack.c.bf16 %v559_v23, %v558_v22  ;;  %v565_v43 = vmax.f32 %v529_v37, 0.0 }
  0xf9   : > { %v572_v34 = vpack.c.bf16 %v557_v27, %v556_v26  ;;  %v1420_v35 = vpop.f32.mrb[4].mxu0  ;;  %v577_v46 = vpack.c.bf16 %v567_v40, %v566_v31 }
  0xfa   : > { %v518_v38 = vadd.f32 %v1420_v35, %v1336_v12  ;;  %v509_v39 = vpop.f32.mrb[5].mxu0  ;;  %v576_v48 = vpack.c.bf16 %v565_v43, %v564_v36  ;;  %v1428_v49 = vpop.f32.mrb[4].mxu1 }
  0xfb   : > { %v510_v41 = vadd.f32 %v1336_v12, %v509_v39  ;;  %v1421_v42 = vpop.f32.mrb[6].mxu0  ;;  %1434 = vmatprep.mubr.msk.bf16.mxu1 %vm598_vm1, %v572_v34  ;;  %v550_v52 = vadd.f32 %v1428_v49, %v1336_v12  ;;  %v541_v53 = vpop.f32.mrb[5].mxu1 }
  0xfc   : > { %v521_v44 = vadd.f32 %v1421_v42, %v1336_v12  ;;  %v512_v45 = vpop.f32.mrb[7].mxu0  ;;  %1435 = vmatmul.mubr.msk.bf16.vlgmr.msra.gmra.mrb[8].mxu1 %vm598_vm1, %v573_v30  ;;  %v562_v50 = vmax.f32 %v518_v38, 0.0  ;;  %v542_v56 = vadd.f32 %v1336_v12, %v541_v53  ;;  %v1429_v57 = vpop.f32.mrb[6].mxu1 }
  0xfd   : > { %v513_v47 = vadd.f32 %v1336_v12, %v512_v45  ;;  %v560_v54 = vmax.f32 %v510_v41, 0.0  ;;  %v570_v59 = vmax.f32 %v550_v52, 0.0  ;;  %v553_v60 = vadd.f32 %v1429_v57, %v1336_v12  ;;  %v544_v61 = vpop.f32.mrb[7].mxu1 }
  0xfe   : > { %v563_v51 = vmax.f32 %v521_v44, 0.0  ;;  %v568_v63 = vmax.f32 %v542_v56, 0.0  ;;  %v545_v0 = vadd.f32 %v1336_v12, %v544_v61 }
  0xff   : > { %v561_v55 = vmax.f32 %v513_v47, 0.0  ;;  %v571_v1 = vmax.f32 %v553_v60, 0.0 }
 0x100   : > { %v575_v58 = vpack.c.bf16 %v563_v51, %v562_v50  ;;  %v569_v2 = vmax.f32 %v545_v0, 0.0 }
 0x101   : > { %v574_v62 = vpack.c.bf16 %v561_v55, %v560_v54  ;;  %v579_v3 = vpack.c.bf16 %v571_v1, %v570_v59 }
 0x102   : > { %v578_v4 = vpack.c.bf16 %v569_v2, %v568_v63 }
 0x103   : > { %1438 = vmatprep.mubr.msk.bf16.mxu1 %vm598_vm1, %v574_v62 }
 0x104   : > { %1439 = vmatmul.mubr.msk.bf16.gmra.mrb[12].mxu1 %vm598_vm1, %v575_v58 }
 0x105   : > { %1442 = vmatprep.mubr.msk.bf16.mxu1 %vm598_vm1, %v576_v48 }
 0x10c   : > { %1443 = vmatmul.mubr.msk.bf16.gmra.mrb[16].mxu1 %vm598_vm1, %v577_v46 }
 0x10d   : > { %1446 = vmatprep.mubr.msk.bf16.mxu1 %vm598_vm1, %v578_v4 }
 0x114   : > { %1447 = vmatmul.mubr.msk.bf16.gmra.mrb[20].mxu1 %vm598_vm1, %v579_v3 }
 0x1cf   : > { %v1436_v7 = vpop.f32.mrb[8].mxu1 }
 0x1d0   : > { %v666_v8 = vadd.f32 %v1436_v7, %v1804_v6  ;;  %v657_v9 = vpop.f32.mrb[9].mxu1 }
 0x1d1   : > { %v658_v10 = vadd.f32 %v1804_v6, %v657_v9  ;;  %v1437_v11 = vpop.f32.mrb[10].mxu1 }
 0x1d2   : > { %v669_v12 = vadd.f32 %v1437_v11, %v1804_v6  ;;  %v660_v13 = vpop.f32.mrb[11].mxu1  ;;  %v722_v16 = vmax.f32 %v666_v8, 0.0 }
 0x1d3   : > { %v720_v14 = vmax.f32 %v658_v10, 0.0  ;;  %v661_v15 = vadd.f32 %v1804_v6, %v660_v13 }
 0x1d4   : > { %v723_v17 = vmax.f32 %v669_v12, 0.0  ;;  %v739_v27 = vsel %vm598_vm1, %v722_v16, 0.0 }
 0x1d5   : > { %v721_v18 = vmax.f32 %v661_v15, 0.0  ;;  %v736_v20 = vsel %vm598_vm1, %v720_v14, 0.0 }
 0x1d6   : > { %v794_v19 = vpack.c.bf16 %v723_v17, %v722_v16  ;;  %v741_v33 = vsel %vm598_vm1, %v723_v17, 0.0 }
 0x1d7   : > { %v737_v21 = vsel %vm598_vm1, %v721_v18, 0.0  ;;  %v793_v22 = vpack.c.bf16 %v721_v18, %v720_v14  ;;  %v1440_v23 = vpop.f32.mrb[12].mxu1 }
 0x1d8   : > { %v738_v24 = vadd.f32 %v737_v21, %v736_v20  ;;  %v682_v25 = vadd.f32 %v1440_v23, %v1804_v6  ;;  %v673_v26 = vpop.f32.mrb[13].mxu1 }
 0x1d9   : > { %v674_v28 = vadd.f32 %v1804_v6, %v673_v26  ;;  %v1441_v29 = vpop.f32.mrb[14].mxu1  ;;  %1454 = vmatprep.mubr.msk.bf16.mxu0 %vm598_vm1, %v793_v22 }
 0x1da   : > { %v740_v30 = vadd.f32 %v739_v27, %v738_v24  ;;  %v685_v31 = vadd.f32 %v1441_v29, %v1804_v6  ;;  %v676_v32 = vpop.f32.mrb[15].mxu1  ;;  %1455 = vmatmul.mubr.msk.bf16.vlgmr.msra.gmra.mrb[8].mxu0 %vm598_vm1, %v794_v19  ;;  %v726_v37 = vmax.f32 %v682_v25, 0.0 }
 0x1db   : > { %v724_v34 = vmax.f32 %v674_v28, 0.0  ;;  %v677_v35 = vadd.f32 %v1804_v6, %v676_v32 }
 0x1dc   : > { %v742_v36 = vadd.f32 %v741_v33, %v740_v30  ;;  %v727_v38 = vmax.f32 %v685_v31, 0.0  ;;  %v752_v50 = vsel %vm598_vm1, %v726_v37, 0.0 }
 0x1dd   : > { %v725_v39 = vmax.f32 %v677_v35, 0.0  ;;  %v749_v42 = vsel %vm598_vm1, %v724_v34, 0.0 }
 0x1de   : > { %v743_v40 = vrot.slane %v742_v36, 4  ;;  %v796_v41 = vpack.c.bf16 %v727_v38, %v726_v37  ;;  %v754_v57 = vsel %vm598_vm1, %v727_v38, 0.0 }
 0x1df   : > { %v750_v43 = vsel %vm598_vm1, %v725_v39, 0.0  ;;  %v795_v44 = vpack.c.bf16 %v725_v39, %v724_v34  ;;  %v1444_v45 = vpop.f32.mrb[16].mxu1 }
 0x1e0   : > { %v744_v46 = vadd.f32 %v743_v40, %v742_v36  ;;  %v751_v47 = vadd.f32 %v750_v43, %v749_v42  ;;  %v698_v48 = vadd.f32 %v1444_v45, %v1804_v6  ;;  %v689_v49 = vpop.f32.mrb[17].mxu1 }
 0x1e1   : > { %v690_v51 = vadd.f32 %v1804_v6, %v689_v49  ;;  %v1445_v52 = vpop.f32.mrb[18].mxu1  ;;  %1458 = vmatprep.mubr.msk.bf16.mxu0 %vm598_vm1, %v795_v44 }
 0x1e2   : > { %v745_v53 = vrot.slane %v744_v46, 2  ;;  %v753_v54 = vadd.f32 %v752_v50, %v751_v47  ;;  %v701_v55 = vadd.f32 %v1445_v52, %v1804_v6  ;;  %v692_v56 = vpop.f32.mrb[19].mxu1  ;;  %1459 = vmatmul.mubr.msk.bf16.gmra.mrb[12].mxu0 %vm598_vm1, %v796_v41  ;;  %v730_v61 = vmax.f32 %v698_v48, 0.0 }
 0x1e3   : > { %v728_v58 = vmax.f32 %v690_v51, 0.0  ;;  %v693_v59 = vadd.f32 %v1804_v6, %v692_v56 }
 0x1e4   : > { %v755_v60 = vadd.f32 %v754_v57, %v753_v54  ;;  %v731_v62 = vmax.f32 %v701_v55, 0.0  ;;  %v746_v0 = vadd.f32 %v745_v53, %v744_v46  ;;  %v765_v11 = vsel %vm598_vm1, %v730_v61, 0.0 }
 0x1e5   : > { %v729_v63 = vmax.f32 %v693_v59, 0.0  ;;  %v762_v3 = vsel %vm598_vm1, %v728_v58, 0.0 }
 0x1e6   : > { %v756_v1 = vrot.slane %v755_v60, 4  ;;  %v798_v2 = vpack.c.bf16 %v731_v62, %v730_v61  ;;  %v747_v15 = vrot.slane %v746_v0, 1  ;;  %v767_v19 = vsel %vm598_vm1, %v731_v62, 0.0 }
 0x1e7   : > { %v763_v4 = vsel %vm598_vm1, %v729_v63, 0.0  ;;  %v797_v5 = vpack.c.bf16 %v729_v63, %v728_v58  ;;  %v1448_v7 = vpop.f32.mrb[20].mxu1 }
 0x1e8   : > { %v757_v8 = vadd.f32 %v756_v1, %v755_v60  ;;  %v764_v9 = vadd.f32 %v763_v4, %v762_v3  ;;  %v705_v10 = vpop.f32.mrb[21].mxu1  ;;  %v714_v12 = vadd.f32 %v1448_v7, %v1804_v6  ;;  %v748_v28 = vadd.f32 %v747_v15, %v746_v0 }
 0x1e9   : > { %v706_v13 = vadd.f32 %v1804_v6, %v705_v10  ;;  %v1449_v14 = vpop.f32.mrb[22].mxu1  ;;  %1462 = vmatprep.mubr.msk.bf16.mxu0 %vm598_vm1, %v797_v5 }
 0x1ea   : > { %v758_v16 = vrot.slane %v757_v8, 2  ;;  %v766_v17 = vadd.f32 %v765_v11, %v764_v9  ;;  %v708_v18 = vpop.f32.mrb[23].mxu1  ;;  %1463 = vmatmul.mubr.msk.bf16.gmra.mrb[16].mxu0 %vm598_vm1, %v798_v2  ;;  %v717_v21 = vadd.f32 %v1449_v14, %v1804_v6  ;;  %v734_v25 = vmax.f32 %v714_v12, 0.0 }
 0x1eb   : > { %v732_v20 = vmax.f32 %v706_v13, 0.0  ;;  %v709_v22 = vadd.f32 %v1804_v6, %v708_v18  ;;  %v789_v6 = vmul.f32 0.03125, %v748_v28 }
 0x1ec   : > { %v759_v23 = vadd.f32 %v758_v16, %v757_v8  ;;  %v768_v24 = vadd.f32 %v767_v19, %v766_v17  ;;  %v735_v26 = vmax.f32 %v717_v21, 0.0  ;;  %v778_v38 = vsel %vm598_vm1, %v734_v25, 0.0 }
 0x1ed   : > { %v733_v27 = vmax.f32 %v709_v22, 0.0  ;;  %v775_v31 = vsel %vm598_vm1, %v732_v20, 0.0 }
 0x1ee   : > { %v760_v29 = vrot.slane %v759_v23, 1  ;;  %v769_v30 = vrot.slane %v768_v24, 4  ;;  %v800_v32 = vpack.c.bf16 %v735_v26, %v734_v25  ;;  %v780_v42 = vsel %vm598_vm1, %v735_v26, 0.0 }
 0x1ef   : > { %v776_v33 = vsel %vm598_vm1, %v733_v27, 0.0  ;;  %v799_v34 = vpack.c.bf16 %v733_v27, %v732_v20 }
 0x1f0   : > { %v761_v35 = vadd.f32 %v760_v29, %v759_v23  ;;  %v770_v36 = vadd.f32 %v769_v30, %v768_v24  ;;  %v777_v37 = vadd.f32 %v776_v33, %v775_v31 }
 0x1f1   : > { %1466 = vmatprep.mubr.msk.bf16.mxu0 %vm598_vm1, %v799_v34 }
 0x1f2   : > { %v790_v39 = vmul.f32 0.03125, %v761_v35  ;;  %v771_v40 = vrot.slane %v770_v36, 2  ;;  %v779_v41 = vadd.f32 %v778_v38, %v777_v37  ;;  %1467 = vmatmul.mubr.msk.bf16.gmra.mrb[20].mxu0 %vm598_vm1, %v800_v32 }
 0x1f4   : > { %v772_v43 = vadd.f32 %v771_v40, %v770_v36  ;;  %v781_v44 = vadd.f32 %v780_v42, %v779_v41  ;;  %v1050_v45 = vsel %vm1049_vm2, %v790_v39, %v789_v6 }
 0x1f6   : > { %v773_v46 = vrot.slane %v772_v43, 1  ;;  %v782_v47 = vrot.slane %v781_v44, 4 }
 0x1f8   : > { %v783_v48 = vadd.f32 %v782_v47, %v781_v44  ;;  %v774_v49 = vadd.f32 %v773_v46, %v772_v43 }
 0x1fa   : > { %v784_v50 = vrot.slane %v783_v48, 2  ;;  %v791_v51 = vmul.f32 0.03125, %v774_v49 }
 0x1fc   : > { %v785_v52 = vadd.f32 %v784_v50, %v783_v48  ;;  %v1052_v53 = vsel %vm1051_vm3, %v791_v51, %v1050_v45 }
 0x1fe   : > { %v786_v54 = vrot.slane %v785_v52, 1 }
 0x200   : > { %v787_v55 = vadd.f32 %v786_v54, %v785_v52 }
 0x202   : > { %v792_v56 = vmul.f32 0.03125, %v787_v55 }
 0x204   : > { %v1054_v57 = vsel %vm1053_vm4, %v792_v56, %v1052_v53 }
 0x205   : > { %1057 = vst.msk [vmem:[%s1850_s17] sm:$0xf] %vm1056_vm5, %v1054_v57 }
 0x2ad   : > { %v1853_v58 = vpop.f32.mrb[8].mxu0 }
 0x2ae   : > { %v1855_v59 = vpop.f32.mrb[9].mxu0  ;;  %v938_v1 = vsel %vm934_vm6, %v1853_v58, 0.0 }
 0x2af   : > { %v1857_v60 = vpop.f32.mrb[10].mxu0  ;;  %v935_v62 = vsel %vm934_vm6, %v1855_v59, 0.0 }
 0x2b0   : > { %v1859_v61 = vpop.f32.mrb[11].mxu0  ;;  %v940_v3 = vsel %vm934_vm6, %v1857_v60, 0.0 }
 0x2b1   : > { %v936_v63 = vsel %vm934_vm6, %v1859_v61, 0.0 }
 0x2b2   : > { %v937_v0 = vadd.f32 %v936_v63, %v935_v62 }
 0x2b4   : > { %v939_v2 = vadd.f32 %v938_v1, %v937_v0 }
 0x2b5   : > { %v1869_v4 = vpop.f32.mrb[12].mxu0 }
 0x2b6   : > { %v941_v5 = vadd.f32 %v940_v3, %v939_v2  ;;  %v1871_v7 = vpop.f32.mrb[13].mxu0  ;;  %v951_v15 = vsel %vm934_vm6, %v1869_v4, 0.0 }
 0x2b7   : > { %v1873_v8 = vpop.f32.mrb[14].mxu0  ;;  %v948_v11 = vsel %vm934_vm6, %v1871_v7, 0.0 }
 0x2b8   : > { %v1875_v9 = vpop.f32.mrb[15].mxu0  ;;  %v942_v10 = vrot.slane %v941_v5, 4  ;;  %v953_v18 = vsel %vm934_vm6, %v1873_v8, 0.0 }
 0x2b9   : > { %v949_v12 = vsel %vm934_vm6, %v1875_v9, 0.0 }
 0x2ba   : > { %v950_v13 = vadd.f32 %v949_v12, %v948_v11  ;;  %v943_v14 = vadd.f32 %v942_v10, %v941_v5 }
 0x2bc   : > { %v952_v16 = vadd.f32 %v951_v15, %v950_v13  ;;  %v944_v17 = vrot.slane %v943_v14, 2 }
 0x2bd   : > { %v1885_v19 = vpop.f32.mrb[16].mxu0 }
 0x2be   : > { %v954_v20 = vadd.f32 %v953_v18, %v952_v16  ;;  %v1887_v21 = vpop.f32.mrb[17].mxu0  ;;  %v945_v22 = vadd.f32 %v944_v17, %v943_v14  ;;  %v964_v32 = vsel %vm934_vm6, %v1885_v19, 0.0 }
 0x2bf   : > { %v1889_v23 = vpop.f32.mrb[18].mxu0  ;;  %v961_v27 = vsel %vm934_vm6, %v1887_v21, 0.0 }
 0x2c0   : > { %v955_v24 = vrot.slane %v954_v20, 4  ;;  %v1891_v25 = vpop.f32.mrb[19].mxu0  ;;  %v946_v26 = vrot.slane %v945_v22, 1  ;;  %v966_v36 = vsel %vm934_vm6, %v1889_v23, 0.0 }
 0x2c1   : > { %v962_v28 = vsel %vm934_vm6, %v1891_v25, 0.0 }
 0x2c2   : > { %v963_v29 = vadd.f32 %v962_v28, %v961_v27  ;;  %v947_v30 = vadd.f32 %v946_v26, %v945_v22  ;;  %v956_v31 = vadd.f32 %v955_v24, %v954_v20 }
 0x2c4   : > { %v965_v33 = vadd.f32 %v964_v32, %v963_v29  ;;  %v987_v34 = vmul.f32 0.03125, %v947_v30  ;;  %v957_v35 = vrot.slane %v956_v31, 2 }
 0x2c5   : > { %v1901_v37 = vpop.f32.mrb[20].mxu0 }
 0x2c6   : > { %v967_v38 = vadd.f32 %v966_v36, %v965_v33  ;;  %995 = vrot.lane.b32.xlu0 %v987_v34, %s1659_s21  ;;  %v1904_v6 = vpop.f32.mrb[21].mxu0  ;;  %v958_v39 = vadd.f32 %v957_v35, %v956_v31  ;;  %v977_v49 = vsel %vm934_vm6, %v1901_v37, 0.0 }
 0x2c7   : > { %v1906_v40 = vpop.f32.mrb[22].mxu0  ;;  %v974_v44 = vsel %vm934_vm6, %v1904_v6, 0.0 }
 0x2c8   : > { %v1908_v41 = vpop.f32.mrb[23].mxu0  ;;  %v959_v42 = vrot.slane %v958_v39, 1  ;;  %v968_v43 = vrot.slane %v967_v38, 4  ;;  %v979_v53 = vsel %vm934_vm6, %v1906_v40, 0.0 }
 0x2c9   : > { %v975_v45 = vsel %vm934_vm6, %v1908_v41, 0.0 }
 0x2ca   : > { %v976_v46 = vadd.f32 %v975_v45, %v974_v44  ;;  %v960_v47 = vadd.f32 %v959_v42, %v958_v39  ;;  %v969_v48 = vadd.f32 %v968_v43, %v967_v38 }
 0x2cc   : > { %v978_v50 = vadd.f32 %v977_v49, %v976_v46  ;;  %v988_v51 = vmul.f32 0.03125, %v960_v47  ;;  %v970_v52 = vrot.slane %v969_v48, 2 }
 0x2ce   : > { %v980_v54 = vadd.f32 %v979_v53, %v978_v50  ;;  %997 = vrot.lane.b32.xlu0 %v988_v51, %s1659_s21  ;;  %v971_v55 = vadd.f32 %v970_v52, %v969_v48 }
 0x2d0   : > { %v981_v56 = vrot.slane %v980_v54, 4  ;;  %v972_v57 = vrot.slane %v971_v55, 1 }
 0x2d2   : > { %v982_v62 = vadd.f32 %v981_v56, %v980_v54  ;;  %v973_v63 = vadd.f32 %v972_v57, %v971_v55 }
 0x2d4   : > { %v989_v0 = vmul.f32 0.03125, %v973_v63  ;;  %v983_v1 = vrot.slane %v982_v62, 2 }
 0x2d6   : > { %999 = vrot.lane.b32.xlu1 %v989_v0, %s1659_s21  ;;  %v984_v2 = vadd.f32 %v983_v1, %v982_v62 }
 0x2d8   : > { %v985_v3 = vrot.slane %v984_v2, 1 }
 0x2da   : > { %v986_v5 = vadd.f32 %v985_v3, %v984_v2 }
 0x2dc   : > { %v990_v10 = vmul.f32 0.03125, %v986_v5 }
 0x2de   : > { %1001 = vrot.lane.b32.xlu1 %v990_v10, %s1659_s21 }
 0x2df   : > { %1548 = shalt.err (!%p1545_p3)
}
 0x2e0   : > { %s1549_s17 = scalar_lea.hbm %s1926_s26, 64  ;;  %s1553_s24 = scalar_lea.hbm %s2151_s7, 128 }
 0x2e1   : > { %p1550_p4 = scmp.ne.s32.totalorder %s1926_s26, %s1549_s17  ;;  %p1554_p9 = scmp.lt.u32.totalorder %s1926_s26, %s2151_s7 }
 0x2e2   : > { %p1555_p10 = scmp.lt.u32.totalorder %s1553_s24, %s1549_s17  ;;  %p1557_p12 = scmp.lt.u32.totalorder %s1549_s17, %s1926_s26 }
 0x2e3   : > { %p1551_p7 = pnand %p1550_p4, %p1753_p5 }
 0x2e4   : > { %p1556_p11 = por %p1555_p10, %p1554_p9 }
 0x2e5   : > { %p1552_p8 = pneg %p1551_p7 }
 0x2e6   : > { %p1558_p13 = por %p1557_p12, %p1556_p11 }
 0x2e8   : > { %p1559_p0 = pnand %p1558_p13, %p1552_p8 }
 0x2ea   : > { %1562 = shalt.err (!%p1559_p0)
}
 0x2eb   : > { %1472 = dma.vmem_to_hbm [thread:$0]  (%p1753_p5), %s1191_s23, 64, %s1926_s26, %s1169_s27   ;;  %v1375_v11 = vld [vmem:[%s2150_s6] ss:$0 sm:$0xff]  ;;  %vm1165_vm7 = vcmask 253952  }
 0x2ec   : > { %s1173_s23 = sand.u32 1, %s1734_s13   ;;  %s1378_s26 = sshll.u32 %s1734_s13, 4 }
 0x2ed   : > { %s338_s27 = scalar_lea.vmem [#allocation4], %s1847_s29  ;;  %s2037_s22 = scalar_lea.hbm %s2152_s8, %s1378_s26 }
 0x2ee   : > { %s1203_s16 = sshll.u32 %s338_s27, 4  ;;  %s2042_s24 = scalar_lea.sflag [#allocation5], %s1173_s23  ;;  %s2039_s16 = int_to_ptr.vmem [resolvable:$true] %s1203_s16 }
 0x2ef   : > { %s1563_s25 = scalar_lea.vmem %s2039_s16, 16  ;;  %s1661_s14 = smov [#allocation4]  }
 0x2f0   : > { %p1564_p1 = scmp.ne.s32.totalorder %s2039_s16, %s1563_s25  ;;  %s1567_s0 = sshll.u32 %s1661_s14, 4  ;;  %s1568_s0 = int_to_ptr.vmem [resolvable:$false] %s1567_s0 }
 0x2f1   : > { %s1569_s28 = scalar_lea.vmem %s1568_s0, 32  ;;  %p1570_p4 = scmp.lt.s32.totalorder %s2039_s16, %s1568_s0 }
 0x2f2   : > { %p1565_p2 = pnand %p1564_p1, %p1753_p5  ;;  %p1571_p7 = scmp.lt.s32.totalorder %s1569_s28, %s1563_s25 }
 0x2f4   : > { %p1566_p3 = pneg %p1565_p2  ;;  %p1572_p8 = por %p1571_p7, %p1570_p4 }
 0x2f6   : > { %p1573_p9 = pnand %p1572_p8, %p1566_p3 }
 0x338   : > { %v996_v12 = vpop.permute.xlu0 %995 }
 0x339   : > { %v1007_v13 = vadd.f32 %v996_v12, %v1855_v59  ;;  %v1008_v14 = vadd.f32 %v996_v12, %v1859_v61  ;;  %v1009_v15 = vadd.f32 %v1853_v58, %v996_v12  ;;  %v1010_v16 = vadd.f32 %v1857_v60, %v996_v12 }
 0x33b   : > { %v1953_v17 = vadd.f32 %v1375_v11, %v1007_v13  ;;  %v1955_v18 = vadd.f32 %v1375_v11, %v1008_v14  ;;  %v1957_v20 = vadd.f32 %v1375_v11, %v1009_v15  ;;  %v1959_v22 = vadd.f32 %v1375_v11, %v1010_v16 }
 0x33d   : > { %v1058_v24 = vsel %vm598_vm1, %v1953_v17, 0.0  ;;  %v1059_v59 = vsel %vm598_vm1, %v1955_v18, 0.0  ;;  %v1061_v58 = vsel %vm598_vm1, %v1957_v20, 0.0  ;;  %v1063_v27 = vsel %vm598_vm1, %v1959_v22, 0.0 }
 0x33e   : > { %v1060_v26 = vadd.f32 %v1059_v59, %v1058_v24 }
 0x340   : > { %v1062_v61 = vadd.f32 %v1061_v58, %v1060_v26  ;;  %v998_v60 = vpop.permute.xlu0 %997 }
 0x341   : > { %v1011_v28 = vadd.f32 %v998_v60, %v1871_v7  ;;  %v1012_v29 = vadd.f32 %v998_v60, %v1875_v9  ;;  %v1013_v30 = vadd.f32 %v1869_v4, %v998_v60  ;;  %v1014_v32 = vadd.f32 %v1873_v8, %v998_v60 }
 0x342   : > { %v1064_v31 = vadd.f32 %v1063_v27, %v1062_v61 }
 0x343   : > { %v1973_v33 = vadd.f32 %v1375_v11, %v1011_v28  ;;  %v1975_v34 = vadd.f32 %v1375_v11, %v1012_v29  ;;  %v1977_v35 = vadd.f32 %v1375_v11, %v1013_v30  ;;  %v1981_v39 = vadd.f32 %v1375_v11, %v1014_v32 }
 0x345   : > { %v1065_v36 = vsel %vm598_vm1, %v1973_v33, 0.0  ;;  %v1067_v7 = vsel %vm598_vm1, %v1975_v34, 0.0  ;;  %v1069_v8 = vsel %vm598_vm1, %v1977_v35, 0.0  ;;  %v1071_v46 = vsel %vm598_vm1, %v1981_v39, 0.0 }
 0x346   : > { %v1066_v38 = vadd.f32 %v1065_v36, %v1064_v31 }
 0x348   : > { %v1068_v9 = vadd.f32 %v1067_v7, %v1066_v38  ;;  %v1000_v4 = vpop.permute.xlu1 %999 }
 0x349   : > { %v1015_v42 = vadd.f32 %v1000_v4, %v1887_v21  ;;  %v1016_v43 = vadd.f32 %v1000_v4, %v1891_v25  ;;  %v1017_v44 = vadd.f32 %v1885_v19, %v1000_v4  ;;  %v1018_v47 = vadd.f32 %v1889_v23, %v1000_v4 }
 0x34a   : > { %v1070_v45 = vadd.f32 %v1069_v8, %v1068_v9 }
 0x34b   : > { %v1993_v48 = vadd.f32 %v1375_v11, %v1015_v42  ;;  %v1995_v49 = vadd.f32 %v1375_v11, %v1016_v43  ;;  %v1997_v51 = vadd.f32 %v1375_v11, %v1017_v44  ;;  %v2001_v25 = vadd.f32 %v1375_v11, %v1018_v47 }
 0x34c   : > { %v1072_v50 = vadd.f32 %v1071_v46, %v1070_v45 }
 0x34d   : > { %v1073_v21 = vsel %vm598_vm1, %v1993_v48, 0.0  ;;  %v1075_v19 = vsel %vm598_vm1, %v1995_v49, 0.0  ;;  %v1077_v23 = vsel %vm598_vm1, %v1997_v51, 0.0  ;;  %v1079_v63 = vsel %vm598_vm1, %v2001_v25, 0.0 }
 0x34e   : > { %v1074_v52 = vadd.f32 %v1073_v21, %v1072_v50 }
 0x350   : > { %v1076_v53 = vadd.f32 %v1075_v19, %v1074_v52  ;;  %v1002_v54 = vpop.permute.xlu1 %1001 }
 0x351   : > { %v1019_v55 = vadd.f32 %v1002_v54, %v1904_v6  ;;  %v1020_v56 = vadd.f32 %v1002_v54, %v1908_v41  ;;  %v1021_v57 = vadd.f32 %v1901_v37, %v1002_v54  ;;  %v1022_v0 = vadd.f32 %v1906_v40, %v1002_v54 }
 0x352   : > { %v1078_v62 = vadd.f32 %v1077_v23, %v1076_v53 }
 0x353   : > { %v2013_v1 = vadd.f32 %v1375_v11, %v1019_v55  ;;  %v2015_v2 = vadd.f32 %v1375_v11, %v1020_v56  ;;  %v2017_v5 = vadd.f32 %v1375_v11, %v1021_v57  ;;  %v2021_v41 = vadd.f32 %v1375_v11, %v1022_v0 }
 0x354   : > { %v1080_v3 = vadd.f32 %v1079_v63, %v1078_v62 }
 0x355   : > { %v1081_v6 = vsel %vm598_vm1, %v2013_v1, 0.0  ;;  %v1083_v10 = vsel %vm598_vm1, %v2015_v2, 0.0  ;;  %v1085_v12 = vsel %vm598_vm1, %v2017_v5, 0.0  ;;  %v1087_v14 = vsel %vm598_vm1, %v2021_v41, 0.0 }
 0x356   : > { %v1082_v37 = vadd.f32 %v1081_v6, %v1080_v3 }
 0x358   : > { %v1084_v40 = vadd.f32 %v1083_v10, %v1082_v37 }
 0x35a   : > { %v1086_v13 = vadd.f32 %v1085_v12, %v1084_v40 }
 0x35c   : > { %v1088_v15 = vadd.f32 %v1087_v14, %v1086_v13 }
 0x35e   : > { %v1089_v16 = vrot.slane %v1088_v15, 4 }
 0x360   : > { %v1090_v24 = vadd.f32 %v1089_v16, %v1088_v15 }
 0x362   : > { %v1091_v59 = vrot.slane %v1090_v24, 2 }
 0x364   : > { %v1092_v26 = vadd.f32 %v1091_v59, %v1090_v24 }
 0x366   : > { %v1093_v11 = vrot.slane %v1092_v26, 1 }
 0x368   : > { %v1094_v58 = vadd.f32 %v1093_v11, %v1092_v26 }
 0x36a   : > { %v1095_v61 = vmul.f32 0.0078125, %v1094_v58  ;;  %1166 = vst.msk [vmem:[%s338_s27] sm:$0x1] %vm1165_vm7, %v1094_v58 }
 0x36b   : > { %1576 = shalt.err (!%p1573_p9)
}
 0x36c   : > { %s1577_s23 = scalar_lea.hbm %s2037_s22, 16  ;;  %s1581_s21 = scalar_lea.hbm %s2152_s8, 32 }
 0x36d   : > { %p1578_p10 = scmp.ne.s32.totalorder %s2037_s22, %s1577_s23  ;;  %p1582_p13 = scmp.lt.u32.totalorder %s2037_s22, %s2152_s8 }
 0x36e   : > { %p1583_p0 = scmp.lt.u32.totalorder %s1581_s21, %s1577_s23  ;;  %p1585_p2 = scmp.lt.u32.totalorder %s1577_s23, %s2037_s22 }
 0x36f   : > { %p1579_p11 = pnand %p1578_p10, %p1753_p5 }
 0x370   : > { %p1584_p1 = por %p1583_p0, %p1582_p13 }
 0x371   : > { %p1580_p12 = pneg %p1579_p11 }
 0x372   : > { %p1586_p3 = por %p1585_p2, %p1584_p1 }
 0x374   : > { %p1587_p4 = pnand %p1586_p3, %p1580_p12 }
 0x376   : > { %1590 = shalt.err (!%p1587_p4)
}
 0x377   : > { %1473 = dma.vmem_to_hbm [thread:$0]  (%p1753_p5), %s2039_s16, 16, %s2037_s22, %s2042_s24   ;;  %v1096_v60 = vsub.f32 %v1953_v17, %v1095_v61  ;;  %v1097_v27 = vsub.f32 %v1955_v18, %v1095_v61  ;;  %v1098_v28 = vsub.f32 %v1957_v20, %v1095_v61  ;;  %v1099_v29 = vsub.f32 %v1959_v22, %v1095_v61 }
 0x378   : > { %v1100_v30 = vsub.f32 %v1973_v33, %v1095_v61  ;;  %v1101_v31 = vsub.f32 %v1975_v34, %v1095_v61  ;;  %v1102_v32 = vsub.f32 %v1977_v35, %v1095_v61  ;;  %v1103_v36 = vsub.f32 %v1981_v39, %v1095_v61  ;;  %s344_s16 = scalar_lea.vmem [#allocation6], %s1847_s29  ;;  %s2104_s23 = scalar_lea.hbm %s2153_s9, %s1378_s26 }
 0x379   : > { %v1104_v38 = vsub.f32 %v1993_v48, %v1095_v61  ;;  %v1105_v7 = vsub.f32 %v1995_v49, %v1095_v61  ;;  %v1106_v17 = vsub.f32 %v1997_v51, %v1095_v61  ;;  %v1107_v18 = vsub.f32 %v2001_v25, %v1095_v61  ;;  %s1216_s22 = sshll.u32 %s344_s16, 4  ;;  %s1662_s17 = smov [#allocation6]   ;;  %s1217_s22 = int_to_ptr.vmem [resolvable:$true] %s1216_s22 }
 0x37a   : > { %v1108_v20 = vsub.f32 %v2013_v1, %v1095_v61  ;;  %v1109_v22 = vsub.f32 %v2015_v2, %v1095_v61  ;;  %v1110_v33 = vsub.f32 %v2017_v5, %v1095_v61  ;;  %v1111_v34 = vsub.f32 %v2021_v41, %v1095_v61  ;;  %s1591_s27 = scalar_lea.vmem %s1217_s22, 16  ;;  %s1595_s21 = sshll.u32 %s1662_s17, 4  ;;  %s1596_s21 = int_to_ptr.vmem [resolvable:$false] %s1595_s21 }
 0x37b   : > { %v1112_v9 = vmul.f32 %v1096_v60, %v1096_v60  ;;  %v1113_v35 = vmul.f32 %v1097_v27, %v1097_v27  ;;  %v1114_v4 = vmul.f32 %v1098_v28, %v1098_v28  ;;  %v1115_v39 = vmul.f32 %v1099_v29, %v1099_v29  ;;  %p1592_p7 = scmp.ne.s32.totalorder %s1217_s22, %s1591_s27  ;;  %s1597_s29 = scalar_lea.vmem %s1596_s21, 32 }
 0x37c   : > { %v1116_v44 = vmul.f32 %v1100_v30, %v1100_v30  ;;  %v1117_v47 = vmul.f32 %v1101_v31, %v1101_v31  ;;  %v1118_v50 = vmul.f32 %v1102_v32, %v1102_v32  ;;  %v1119_v52 = vmul.f32 %v1103_v36, %v1103_v36  ;;  %p1598_p10 = scmp.lt.s32.totalorder %s1217_s22, %s1596_s21  ;;  %p1599_p11 = scmp.lt.s32.totalorder %s1597_s29, %s1591_s27 }
 0x37d   : > { %v1128_v8 = vsel %vm598_vm1, %v1112_v9, 0.0  ;;  %v1129_v42 = vsel %vm598_vm1, %v1113_v35, 0.0  ;;  %v1131_v45 = vsel %vm598_vm1, %v1114_v4, 0.0  ;;  %v1133_v48 = vsel %vm598_vm1, %v1115_v39, 0.0  ;;  %p1593_p8 = pnand %p1592_p7, %p1753_p5 }
 0x37e   : > { %v1130_v43 = vadd.f32 %v1129_v42, %v1128_v8  ;;  %v1135_v51 = vsel %vm598_vm1, %v1116_v44, 0.0  ;;  %v1137_v25 = vsel %vm598_vm1, %v1117_v47, 0.0  ;;  %v1120_v53 = vmul.f32 %v1104_v38, %v1104_v38  ;;  %p1600_p12 = por %p1599_p11, %p1598_p10 }
 0x37f   : > { %v1139_v54 = vsel %vm598_vm1, %v1118_v50, 0.0  ;;  %v1121_v55 = vmul.f32 %v1105_v7, %v1105_v7  ;;  %v1141_v56 = vsel %vm598_vm1, %v1119_v52, 0.0  ;;  %v1122_v62 = vmul.f32 %v1106_v17, %v1106_v17  ;;  %p1594_p9 = pneg %p1593_p8 }
 0x380   : > { %v1132_v46 = vadd.f32 %v1131_v45, %v1130_v43  ;;  %v1143_v63 = vsel %vm598_vm1, %v1120_v53, 0.0  ;;  %v1123_v1 = vmul.f32 %v1107_v18, %v1107_v18  ;;  %v1124_v5 = vmul.f32 %v1108_v20, %v1108_v20 }
 0x381   : > { %v1145_v2 = vsel %vm598_vm1, %v1121_v55, 0.0  ;;  %v1147_v6 = vsel %vm598_vm1, %v1122_v62, 0.0  ;;  %v1125_v41 = vmul.f32 %v1109_v22, %v1109_v22  ;;  %v1126_v12 = vmul.f32 %v1110_v33, %v1110_v33  ;;  %p1601_p13 = pnand %p1600_p12, %p1594_p9 }
 0x382   : > { %v1134_v49 = vadd.f32 %v1133_v48, %v1132_v46  ;;  %v1149_v10 = vsel %vm598_vm1, %v1123_v1, 0.0  ;;  %v1151_v13 = vsel %vm598_vm1, %v1124_v5, 0.0  ;;  %v1127_v15 = vmul.f32 %v1111_v34, %v1111_v34 }
 0x383   : > { %v1153_v16 = vsel %vm598_vm1, %v1125_v41, 0.0  ;;  %v1155_v59 = vsel %vm598_vm1, %v1126_v12, 0.0 }
 0x384   : > { %v1136_v21 = vadd.f32 %v1135_v51, %v1134_v49  ;;  %v1157_v11 = vsel %vm598_vm1, %v1127_v15, 0.0 }
 0x386   : > { %v1138_v19 = vadd.f32 %v1137_v25, %v1136_v21 }
 0x388   : > { %v1140_v23 = vadd.f32 %v1139_v54, %v1138_v19 }
 0x38a   : > { %v1142_v57 = vadd.f32 %v1141_v56, %v1140_v23 }
 0x38c   : > { %v1144_v0 = vadd.f32 %v1143_v63, %v1142_v57 }
 0x38e   : > { %v1146_v3 = vadd.f32 %v1145_v2, %v1144_v0 }
 0x390   : > { %v1148_v37 = vadd.f32 %v1147_v6, %v1146_v3 }
 0x392   : > { %v1150_v40 = vadd.f32 %v1149_v10, %v1148_v37 }
 0x394   : > { %v1152_v14 = vadd.f32 %v1151_v13, %v1150_v40 }
 0x396   : > { %v1154_v24 = vadd.f32 %v1153_v16, %v1152_v14 }
 0x398   : > { %v1156_v26 = vadd.f32 %v1155_v59, %v1154_v24 }
 0x39a   : > { %v1158_v58 = vadd.f32 %v1157_v11, %v1156_v26 }
 0x39c   : > { %v1159_v61 = vrot.slane %v1158_v58, 4 }
 0x39e   : > { %v1160_v60 = vadd.f32 %v1159_v61, %v1158_v58 }
 0x3a0   : > { %v1161_v27 = vrot.slane %v1160_v60, 2 }
 0x3a2   : > { %v1162_v28 = vadd.f32 %v1161_v27, %v1160_v60 }
 0x3a4   : > { %v1163_v29 = vrot.slane %v1162_v28, 1 }
 0x3a6   : > { %v1164_v30 = vadd.f32 %v1163_v29, %v1162_v28 }
 0x3a8   : > { %1167 = vst.msk [vmem:[%s344_s16] sm:$0x1] %vm1165_vm7, %v1164_v30 }
 0x3a9   : > { %1604 = shalt.err (!%p1601_p13)
}
 0x3aa   : > { %s1605_s13 = scalar_lea.hbm %s2104_s23, 16  ;;  %s1609_s0 = scalar_lea.hbm %s2153_s9, 32 }
 0x3ab   : > { %p1606_p0 = scmp.ne.s32.totalorder %s2104_s23, %s1605_s13  ;;  %p1610_p3 = scmp.lt.u32.totalorder %s2104_s23, %s2153_s9 }
 0x3ac   : > { %p1611_p4 = scmp.lt.u32.totalorder %s1609_s0, %s1605_s13  ;;  %p1613_p8 = scmp.lt.u32.totalorder %s1605_s13, %s2104_s23 }
 0x3ad   : > { %p1607_p1 = pnand %p1606_p0, %p1753_p5 }
 0x3ae   : > { %p1612_p7 = por %p1611_p4, %p1610_p3 }
 0x3af   : > { %p1608_p2 = pneg %p1607_p1 }
 0x3b0   : > { %p1614_p9 = por %p1613_p8, %p1612_p7 }
 0x3b2   : > { %p1615_p10 = pnand %p1614_p9, %p1608_p2 }
 0x3b4   : > { %1618 = shalt.err (!%p1615_p10)
}
 0x3b5   : > { %1474 = dma.vmem_to_hbm [thread:$0]  (%p1753_p5), %s1217_s22, 16, %s2104_s23, %s2042_s24  }
 0x3b6 PF: > { %p1488_p11 = scmp.ge.s32.totalorder %s1657_s12, 2  ;;  %s1228_s28 = sand.u32 1, %s1645_s30  }
 0x3b7   : > { %s1229_s27 = scalar_lea.sflag [#allocation3], %s1228_s28 }
 0x3b8   : > { %p1479_p12 = pnand %p1488_p11, %p1757_p6 }
 0x3ba   : > { %1636 = dma.done.wait (!%p1479_p12), %s1229_s27, 64  }
 0x3bb   : > { %1638 = vsyncadd (!%p1479_p12), %s1229_s27, 4294967232  ;;  %s2159_s17 = sadd.s32 4294967294, %s1657_s12  }
 0x3bc   : > { %s1237_s21 = sand.u32 1, %s2159_s17  }
 0x3bd   : > { %s1238_s29 = scalar_lea.sflag [#allocation5], %s1237_s21 }
 0x3be   : > { %1640 = dma.done.wait (!%p1479_p12), %s1238_s29, 32  }
 0x3bf   : > { %1642 = vsyncadd (!%p1479_p12), %s1238_s29, 4294967264  ;;  %p23_p5 = scmp.ge.s32.totalorder %s1738_s15, 4   ;;  %s2160_s30 = smov %s1649_s10 }
 0x3c0   : > { %s2161_s10 = smov %s1653_s11  ;;  %s2162_s11 = smov %s1751_s18 }
 0x3c1   : > { %s2163_s12 = smov %s1738_s15  ;;  %25 = sbr.rel (!%p23_p5) target bundleno = 7 (0x7), region = 115 }
 0x3c8   :  { %1250 = vsyncpa [#allocation3], 1 }
 0x3c9   :  { %1252 = vsyncpa [#allocation3 + $0x1], 1 }
 0x3ca   :  { %1253 = vsyncpa [#allocation5], 1 }
 0x3cb   :  { %1255 = vsyncpa [#allocation5 + $0x1], 1 }

</bundles_post_ra>
